<compile_context>
chip_gen: v7x
topology: tpu7x:2x2x1
jax: 0.10.0
libtpu: 0.0.40
codegen_flags: <defaults>
</compile_context>

<pallas_src>
import jax
import jax.numpy as jnp
from jax.experimental import pallas as pl
from jax.experimental.pallas import tpu as pltpu

LANE = 128      # vreg lane width
SUBLANE = 8     # vreg sublane count (f32)


def mlp_kernel(w1_ref, b1_ref, w2_ref, b2_ref, x_ref, o_ref):
    # w1_ref, b1_ref, w2_ref : (H,)  f32 in SMEM (read as scalars)
    # b2_ref                 : (1,)  f32 in SMEM
    # x_ref, o_ref           : (TILE_R, 128) f32 in VMEM, batch in lanes
    x = x_ref[...]
    acc = jnp.zeros_like(x)
    # H is small & static (e.g. 32): unrolled VPU mul/add/max chain,
    # scalar weights broadcast from SMEM — no MXU, no masked stores.
    for h in range(w1_ref.shape[0]):
        hidden = jnp.maximum(x * w1_ref[h] + b1_ref[h], 0.0)
        acc = acc + hidden * w2_ref[h]
    o_ref[...] = (acc + b2_ref[0]).astype(o_ref.dtype)


def net_forward(x, w1, b1, w2, b2, *, tile_rows=512):
    """x: (B, 1) f32.  w1: (H, 1), b1: (H,), w2: (1, H), b2: (1,) — PyTorch layouts."""
    B = x.shape[0]
    H = w1.shape[0]

    # Flatten parameters once (pure reshapes, no transposes needed).
    w1_v = w1.reshape(H).astype(jnp.float32)
    b1_v = b1.reshape(H).astype(jnp.float32)
    w2_v = w2.reshape(H).astype(jnp.float32)
    b2_v = b2.reshape(1).astype(jnp.float32)

    # Lane-dense layout: batch lives on the 128-lane axis, tiles of
    # (tile_rows, 128) f32 (>= 256 KiB at tile_rows=512) are auto
    # double-buffered by the BlockSpec pipeline.
    rows_needed = max(1, pl.cdiv(B, LANE))
    rows_aligned = pl.cdiv(rows_needed, SUBLANE) * SUBLANE
    tile_r = min(tile_rows, rows_aligned)
    rows = pl.cdiv(rows_aligned, tile_r) * tile_r
    pad = rows * LANE - B
    xp = jnp.pad(x.reshape(-1).astype(jnp.float32), (0, pad)).reshape(rows, LANE)

    smem = pl.BlockSpec(memory_space=pltpu.MemorySpace.SMEM)

    out = pl.pallas_call(
        mlp_kernel,
        out_shape=jax.ShapeDtypeStruct((rows, LANE), jnp.float32),
        grid=(rows // tile_r,),
        in_specs=[smem, smem, smem, smem,
                  pl.BlockSpec((tile_r, LANE), lambda i: (i, 0))],
        out_specs=pl.BlockSpec((tile_r, LANE), lambda i: (i, 0)),
        compiler_params=pltpu.CompilerParams(
            dimension_semantics=("parallel",)),   # megacore / 2-TC sharding
    )(w1_v, b1_v, w2_v, b2_v, xp)

    return out.reshape(-1)[:B].reshape(B, 1)


if __name__ == "__main__":
    hidden_size = 32
    batch = 8

    key = jax.random.PRNGKey(0)
    kx, kw1, kb1, kw2, kb2 = jax.random.split(key, 5)

    # Deterministic synthetic parameters (PyTorch nn.Linear shapes: (out, in)).
    x = jax.random.normal(kx, (batch, 1), dtype=jnp.float32)
    w1 = jax.random.normal(kw1, (hidden_size, 1), dtype=jnp.float32) * 0.5
    b1 = jax.random.normal(kb1, (hidden_size,), dtype=jnp.float32) * 0.1
    w2 = jax.random.normal(kw2, (1, hidden_size), dtype=jnp.float32) * 0.5
    b2 = jax.random.normal(kb2, (1,), dtype=jnp.float32) * 0.1

    out = net_forward(x, w1, b1, w2, b2)
    jax.block_until_ready(out)

    # Pure-JAX reference of the same forward pass.
    ref = jnp.maximum(x @ w1.T + b1, 0.0) @ w2.T + b2
    assert out.shape == (batch, 1)
    assert jnp.allclose(out, ref, atol=1e-5, rtol=1e-5)

    print("KERNEL_OK")
</pallas_src>

<mosaic_0001>
module attributes {stable_mosaic.version = 11 : i64} {
  func.func @mlp_kernel(%arg0: i32, %arg1: memref<32xf32, #tpu.memory_space<smem>>, %arg2: memref<32xf32, #tpu.memory_space<smem>>, %arg3: memref<32xf32, #tpu.memory_space<smem>>, %arg4: memref<1xf32, #tpu.memory_space<smem>>, %arg5: memref<8x128xf32, #tpu.memory_space<vmem>>, %arg6: memref<8x128xf32, #tpu.memory_space<vmem>>) attributes {dimension_semantics = [#tpu.dimension_semantics<parallel>], iteration_bounds = array<i64: 1>, scalar_prefetch = 0 : i64, scratch_operands = 0 : i64, tpu.core_type = #tpu.core_type<tc>, window_params = [{transform_indices = @transform_0, window_bounds = array<i64: 32>}, {transform_indices = @transform_1, window_bounds = array<i64: 32>}, {transform_indices = @transform_2, window_bounds = array<i64: 32>}, {transform_indices = @transform_3, window_bounds = array<i64: 1>}, {transform_indices = @transform_4, window_bounds = array<i64: 8, 128>}, {transform_indices = @transform_5, window_bounds = array<i64: 8, 128>}]} {
    %c0 = arith.constant 0 : index
    %c0_0 = arith.constant 0 : index
    %0 = vector.load %arg5[%c0, %c0_0] : memref<8x128xf32, #tpu.memory_space<vmem>>, vector<8x128xf32>
    %cst = arith.constant 0.000000e+00 : f32
    %1 = vector.broadcast %cst : f32 to vector<8x128xf32>
    %c0_1 = arith.constant 0 : index
    %2 = memref.load %arg1[%c0_1] : memref<32xf32, #tpu.memory_space<smem>>
    %3 = vector.broadcast %2 : f32 to vector<8x128xf32>
    %4 = arith.mulf %0, %3 : vector<8x128xf32>
    %c0_2 = arith.constant 0 : index
    %5 = memref.load %arg2[%c0_2] : memref<32xf32, #tpu.memory_space<smem>>
    %6 = vector.broadcast %5 : f32 to vector<8x128xf32>
    %7 = arith.addf %4, %6 : vector<8x128xf32>
    %cst_3 = arith.constant 0.000000e+00 : f32
    %8 = vector.broadcast %cst_3 : f32 to vector<8x128xf32>
    %9 = arith.maximumf %7, %8 : vector<8x128xf32>
    %c0_4 = arith.constant 0 : index
    %10 = memref.load %arg3[%c0_4] : memref<32xf32, #tpu.memory_space<smem>>
    %11 = vector.broadcast %10 : f32 to vector<8x128xf32>
    %12 = arith.mulf %9, %11 : vector<8x128xf32>
    %13 = arith.addf %1, %12 : vector<8x128xf32>
    %c1 = arith.constant 1 : index
    %14 = memref.load %arg1[%c1] : memref<32xf32, #tpu.memory_space<smem>>
    %15 = vector.broadcast %14 : f32 to vector<8x128xf32>
    %16 = arith.mulf %0, %15 : vector<8x128xf32>
    %c1_5 = arith.constant 1 : index
    %17 = memref.load %arg2[%c1_5] : memref<32xf32, #tpu.memory_space<smem>>
    %18 = vector.broadcast %17 : f32 to vector<8x128xf32>
    %19 = arith.addf %16, %18 : vector<8x128xf32>
    %cst_6 = arith.constant 0.000000e+00 : f32
    %20 = vector.broadcast %cst_6 : f32 to vector<8x128xf32>
    %21 = arith.maximumf %19, %20 : vector<8x128xf32>
    %c1_7 = arith.constant 1 : index
    %22 = memref.load %arg3[%c1_7] : memref<32xf32, #tpu.memory_space<smem>>
    %23 = vector.broadcast %22 : f32 to vector<8x128xf32>
    %24 = arith.mulf %21, %23 : vector<8x128xf32>
    %25 = arith.addf %13, %24 : vector<8x128xf32>
    %c2 = arith.constant 2 : index
    %26 = memref.load %arg1[%c2] : memref<32xf32, #tpu.memory_space<smem>>
    %27 = vector.broadcast %26 : f32 to vector<8x128xf32>
    %28 = arith.mulf %0, %27 : vector<8x128xf32>
    %c2_8 = arith.constant 2 : index
    %29 = memref.load %arg2[%c2_8] : memref<32xf32, #tpu.memory_space<smem>>
    %30 = vector.broadcast %29 : f32 to vector<8x128xf32>
    %31 = arith.addf %28, %30 : vector<8x128xf32>
    %cst_9 = arith.constant 0.000000e+00 : f32
    %32 = vector.broadcast %cst_9 : f32 to vector<8x128xf32>
    %33 = arith.maximumf %31, %32 : vector<8x128xf32>
    %c2_10 = arith.constant 2 : index
    %34 = memref.load %arg3[%c2_10] : memref<32xf32, #tpu.memory_space<smem>>
    %35 = vector.broadcast %34 : f32 to vector<8x128xf32>
    %36 = arith.mulf %33, %35 : vector<8x128xf32>
    %37 = arith.addf %25, %36 : vector<8x128xf32>
    %c3 = arith.constant 3 : index
    %38 = memref.load %arg1[%c3] : memref<32xf32, #tpu.memory_space<smem>>
    %39 = vector.broadcast %38 : f32 to vector<8x128xf32>
    %40 = arith.mulf %0, %39 : vector<8x128xf32>
    %c3_11 = arith.constant 3 : index
    %41 = memref.load %arg2[%c3_11] : memref<32xf32, #tpu.memory_space<smem>>
    %42 = vector.broadcast %41 : f32 to vector<8x128xf32>
    %43 = arith.addf %40, %42 : vector<8x128xf32>
    %cst_12 = arith.constant 0.000000e+00 : f32
    %44 = vector.broadcast %cst_12 : f32 to vector<8x128xf32>
    %45 = arith.maximumf %43, %44 : vector<8x128xf32>
    %c3_13 = arith.constant 3 : index
    %46 = memref.load %arg3[%c3_13] : memref<32xf32, #tpu.memory_space<smem>>
    %47 = vector.broadcast %46 : f32 to vector<8x128xf32>
    %48 = arith.mulf %45, %47 : vector<8x128xf32>
    %49 = arith.addf %37, %48 : vector<8x128xf32>
    %c4 = arith.constant 4 : index
    %50 = memref.load %arg1[%c4] : memref<32xf32, #tpu.memory_space<smem>>
    %51 = vector.broadcast %50 : f32 to vector<8x128xf32>
    %52 = arith.mulf %0, %51 : vector<8x128xf32>
    %c4_14 = arith.constant 4 : index
    %53 = memref.load %arg2[%c4_14] : memref<32xf32, #tpu.memory_space<smem>>
    %54 = vector.broadcast %53 : f32 to vector<8x128xf32>
    %55 = arith.addf %52, %54 : vector<8x128xf32>
    %cst_15 = arith.constant 0.000000e+00 : f32
    %56 = vector.broadcast %cst_15 : f32 to vector<8x128xf32>
    %57 = arith.maximumf %55, %56 : vector<8x128xf32>
    %c4_16 = arith.constant 4 : index
    %58 = memref.load %arg3[%c4_16] : memref<32xf32, #tpu.memory_space<smem>>
    %59 = vector.broadcast %58 : f32 to vector<8x128xf32>
    %60 = arith.mulf %57, %59 : vector<8x128xf32>
    %61 = arith.addf %49, %60 : vector<8x128xf32>
    %c5 = arith.constant 5 : index
    %62 = memref.load %arg1[%c5] : memref<32xf32, #tpu.memory_space<smem>>
    %63 = vector.broadcast %62 : f32 to vector<8x128xf32>
    %64 = arith.mulf %0, %63 : vector<8x128xf32>
    %c5_17 = arith.constant 5 : index
    %65 = memref.load %arg2[%c5_17] : memref<32xf32, #tpu.memory_space<smem>>
    %66 = vector.broadcast %65 : f32 to vector<8x128xf32>
    %67 = arith.addf %64, %66 : vector<8x128xf32>
    %cst_18 = arith.constant 0.000000e+00 : f32
    %68 = vector.broadcast %cst_18 : f32 to vector<8x128xf32>
    %69 = arith.maximumf %67, %68 : vector<8x128xf32>
    %c5_19 = arith.constant 5 : index
    %70 = memref.load %arg3[%c5_19] : memref<32xf32, #tpu.memory_space<smem>>
    %71 = vector.broadcast %70 : f32 to vector<8x128xf32>
    %72 = arith.mulf %69, %71 : vector<8x128xf32>
    %73 = arith.addf %61, %72 : vector<8x128xf32>
    %c6 = arith.constant 6 : index
    %74 = memref.load %arg1[%c6] : memref<32xf32, #tpu.memory_space<smem>>
    %75 = vector.broadcast %74 : f32 to vector<8x128xf32>
    %76 = arith.mulf %0, %75 : vector<8x128xf32>
    %c6_20 = arith.constant 6 : index
    %77 = memref.load %arg2[%c6_20] : memref<32xf32, #tpu.memory_space<smem>>
    %78 = vector.broadcast %77 : f32 to vector<8x128xf32>
    %79 = arith.addf %76, %78 : vector<8x128xf32>
    %cst_21 = arith.constant 0.000000e+00 : f32
    %80 = vector.broadcast %cst_21 : f32 to vector<8x128xf32>
    %81 = arith.maximumf %79, %80 : vector<8x128xf32>
    %c6_22 = arith.constant 6 : index
    %82 = memref.load %arg3[%c6_22] : memref<32xf32, #tpu.memory_space<smem>>
    %83 = vector.broadcast %82 : f32 to vector<8x128xf32>
    %84 = arith.mulf %81, %83 : vector<8x128xf32>
    %85 = arith.addf %73, %84 : vector<8x128xf32>
    %c7 = arith.constant 7 : index
    %86 = memref.load %arg1[%c7] : memref<32xf32, #tpu.memory_space<smem>>
    %87 = vector.broadcast %86 : f32 to vector<8x128xf32>
    %88 = arith.mulf %0, %87 : vector<8x128xf32>
    %c7_23 = arith.constant 7 : index
    %89 = memref.load %arg2[%c7_23] : memref<32xf32, #tpu.memory_space<smem>>
    %90 = vector.broadcast %89 : f32 to vector<8x128xf32>
    %91 = arith.addf %88, %90 : vector<8x128xf32>
    %cst_24 = arith.constant 0.000000e+00 : f32
    %92 = vector.broadcast %cst_24 : f32 to vector<8x128xf32>
    %93 = arith.maximumf %91, %92 : vector<8x128xf32>
    %c7_25 = arith.constant 7 : index
    %94 = memref.load %arg3[%c7_25] : memref<32xf32, #tpu.memory_space<smem>>
    %95 = vector.broadcast %94 : f32 to vector<8x128xf32>
    %96 = arith.mulf %93, %95 : vector<8x128xf32>
    %97 = arith.addf %85, %96 : vector<8x128xf32>
    %c8 = arith.constant 8 : index
    %98 = memref.load %arg1[%c8] : memref<32xf32, #tpu.memory_space<smem>>
    %99 = vector.broadcast %98 : f32 to vector<8x128xf32>
    %100 = arith.mulf %0, %99 : vector<8x128xf32>
    %c8_26 = arith.constant 8 : index
    %101 = memref.load %arg2[%c8_26] : memref<32xf32, #tpu.memory_space<smem>>
    %102 = vector.broadcast %101 : f32 to vector<8x128xf32>
    %103 = arith.addf %100, %102 : vector<8x128xf32>
    %cst_27 = arith.constant 0.000000e+00 : f32
    %104 = vector.broadcast %cst_27 : f32 to vector<8x128xf32>
    %105 = arith.maximumf %103, %104 : vector<8x128xf32>
    %c8_28 = arith.constant 8 : index
    %106 = memref.load %arg3[%c8_28] : memref<32xf32, #tpu.memory_space<smem>>
    %107 = vector.broadcast %106 : f32 to vector<8x128xf32>
    %108 = arith.mulf %105, %107 : vector<8x128xf32>
    %109 = arith.addf %97, %108 : vector<8x128xf32>
    %c9 = arith.constant 9 : index
    %110 = memref.load %arg1[%c9] : memref<32xf32, #tpu.memory_space<smem>>
    %111 = vector.broadcast %110 : f32 to vector<8x128xf32>
    %112 = arith.mulf %0, %111 : vector<8x128xf32>
    %c9_29 = arith.constant 9 : index
    %113 = memref.load %arg2[%c9_29] : memref<32xf32, #tpu.memory_space<smem>>
    %114 = vector.broadcast %113 : f32 to vector<8x128xf32>
    %115 = arith.addf %112, %114 : vector<8x128xf32>
    %cst_30 = arith.constant 0.000000e+00 : f32
    %116 = vector.broadcast %cst_30 : f32 to vector<8x128xf32>
    %117 = arith.maximumf %115, %116 : vector<8x128xf32>
    %c9_31 = arith.constant 9 : index
    %118 = memref.load %arg3[%c9_31] : memref<32xf32, #tpu.memory_space<smem>>
    %119 = vector.broadcast %118 : f32 to vector<8x128xf32>
    %120 = arith.mulf %117, %119 : vector<8x128xf32>
    %121 = arith.addf %109, %120 : vector<8x128xf32>
    %c10 = arith.constant 10 : index
    %122 = memref.load %arg1[%c10] : memref<32xf32, #tpu.memory_space<smem>>
    %123 = vector.broadcast %122 : f32 to vector<8x128xf32>
    %124 = arith.mulf %0, %123 : vector<8x128xf32>
    %c10_32 = arith.constant 10 : index
    %125 = memref.load %arg2[%c10_32] : memref<32xf32, #tpu.memory_space<smem>>
    %126 = vector.broadcast %125 : f32 to vector<8x128xf32>
    %127 = arith.addf %124, %126 : vector<8x128xf32>
    %cst_33 = arith.constant 0.000000e+00 : f32
    %128 = vector.broadcast %cst_33 : f32 to vector<8x128xf32>
    %129 = arith.maximumf %127, %128 : vector<8x128xf32>
    %c10_34 = arith.constant 10 : index
    %130 = memref.load %arg3[%c10_34] : memref<32xf32, #tpu.memory_space<smem>>
    %131 = vector.broadcast %130 : f32 to vector<8x128xf32>
    %132 = arith.mulf %129, %131 : vector<8x128xf32>
    %133 = arith.addf %121, %132 : vector<8x128xf32>
    %c11 = arith.constant 11 : index
    %134 = memref.load %arg1[%c11] : memref<32xf32, #tpu.memory_space<smem>>
    %135 = vector.broadcast %134 : f32 to vector<8x128xf32>
    %136 = arith.mulf %0, %135 : vector<8x128xf32>
    %c11_35 = arith.constant 11 : index
    %137 = memref.load %arg2[%c11_35] : memref<32xf32, #tpu.memory_space<smem>>
    %138 = vector.broadcast %137 : f32 to vector<8x128xf32>
    %139 = arith.addf %136, %138 : vector<8x128xf32>
    %cst_36 = arith.constant 0.000000e+00 : f32
    %140 = vector.broadcast %cst_36 : f32 to vector<8x128xf32>
    %141 = arith.maximumf %139, %140 : vector<8x128xf32>
    %c11_37 = arith.constant 11 : index
    %142 = memref.load %arg3[%c11_37] : memref<32xf32, #tpu.memory_space<smem>>
    %143 = vector.broadcast %142 : f32 to vector<8x128xf32>
    %144 = arith.mulf %141, %143 : vector<8x128xf32>
    %145 = arith.addf %133, %144 : vector<8x128xf32>
    %c12 = arith.constant 12 : index
    %146 = memref.load %arg1[%c12] : memref<32xf32, #tpu.memory_space<smem>>
    %147 = vector.broadcast %146 : f32 to vector<8x128xf32>
    %148 = arith.mulf %0, %147 : vector<8x128xf32>
    %c12_38 = arith.constant 12 : index
    %149 = memref.load %arg2[%c12_38] : memref<32xf32, #tpu.memory_space<smem>>
    %150 = vector.broadcast %149 : f32 to vector<8x128xf32>
    %151 = arith.addf %148, %150 : vector<8x128xf32>
    %cst_39 = arith.constant 0.000000e+00 : f32
    %152 = vector.broadcast %cst_39 : f32 to vector<8x128xf32>
    %153 = arith.maximumf %151, %152 : vector<8x128xf32>
    %c12_40 = arith.constant 12 : index
    %154 = memref.load %arg3[%c12_40] : memref<32xf32, #tpu.memory_space<smem>>
    %155 = vector.broadcast %154 : f32 to vector<8x128xf32>
    %156 = arith.mulf %153, %155 : vector<8x128xf32>
    %157 = arith.addf %145, %156 : vector<8x128xf32>
    %c13 = arith.constant 13 : index
    %158 = memref.load %arg1[%c13] : memref<32xf32, #tpu.memory_space<smem>>
    %159 = vector.broadcast %158 : f32 to vector<8x128xf32>
    %160 = arith.mulf %0, %159 : vector<8x128xf32>
    %c13_41 = arith.constant 13 : index
    %161 = memref.load %arg2[%c13_41] : memref<32xf32, #tpu.memory_space<smem>>
    %162 = vector.broadcast %161 : f32 to vector<8x128xf32>
    %163 = arith.addf %160, %162 : vector<8x128xf32>
    %cst_42 = arith.constant 0.000000e+00 : f32
    %164 = vector.broadcast %cst_42 : f32 to vector<8x128xf32>
    %165 = arith.maximumf %163, %164 : vector<8x128xf32>
    %c13_43 = arith.constant 13 : index
    %166 = memref.load %arg3[%c13_43] : memref<32xf32, #tpu.memory_space<smem>>
    %167 = vector.broadcast %166 : f32 to vector<8x128xf32>
    %168 = arith.mulf %165, %167 : vector<8x128xf32>
    %169 = arith.addf %157, %168 : vector<8x128xf32>
    %c14 = arith.constant 14 : index
    %170 = memref.load %arg1[%c14] : memref<32xf32, #tpu.memory_space<smem>>
    %171 = vector.broadcast %170 : f32 to vector<8x128xf32>
    %172 = arith.mulf %0, %171 : vector<8x128xf32>
    %c14_44 = arith.constant 14 : index
    %173 = memref.load %arg2[%c14_44] : memref<32xf32, #tpu.memory_space<smem>>
    %174 = vector.broadcast %173 : f32 to vector<8x128xf32>
    %175 = arith.addf %172, %174 : vector<8x128xf32>
    %cst_45 = arith.constant 0.000000e+00 : f32
    %176 = vector.broadcast %cst_45 : f32 to vector<8x128xf32>
    %177 = arith.maximumf %175, %176 : vector<8x128xf32>
    %c14_46 = arith.constant 14 : index
    %178 = memref.load %arg3[%c14_46] : memref<32xf32, #tpu.memory_space<smem>>
    %179 = vector.broadcast %178 : f32 to vector<8x128xf32>
    %180 = arith.mulf %177, %179 : vector<8x128xf32>
    %181 = arith.addf %169, %180 : vector<8x128xf32>
    %c15 = arith.constant 15 : index
    %182 = memref.load %arg1[%c15] : memref<32xf32, #tpu.memory_space<smem>>
    %183 = vector.broadcast %182 : f32 to vector<8x128xf32>
    %184 = arith.mulf %0, %183 : vector<8x128xf32>
    %c15_47 = arith.constant 15 : index
    %185 = memref.load %arg2[%c15_47] : memref<32xf32, #tpu.memory_space<smem>>
    %186 = vector.broadcast %185 : f32 to vector<8x128xf32>
    %187 = arith.addf %184, %186 : vector<8x128xf32>
    %cst_48 = arith.constant 0.000000e+00 : f32
    %188 = vector.broadcast %cst_48 : f32 to vector<8x128xf32>
    %189 = arith.maximumf %187, %188 : vector<8x128xf32>
    %c15_49 = arith.constant 15 : index
    %190 = memref.load %arg3[%c15_49] : memref<32xf32, #tpu.memory_space<smem>>
    %191 = vector.broadcast %190 : f32 to vector<8x128xf32>
    %192 = arith.mulf %189, %191 : vector<8x128xf32>
    %193 = arith.addf %181, %192 : vector<8x128xf32>
    %c16 = arith.constant 16 : index
    %194 = memref.load %arg1[%c16] : memref<32xf32, #tpu.memory_space<smem>>
    %195 = vector.broadcast %194 : f32 to vector<8x128xf32>
    %196 = arith.mulf %0, %195 : vector<8x128xf32>
    %c16_50 = arith.constant 16 : index
    %197 = memref.load %arg2[%c16_50] : memref<32xf32, #tpu.memory_space<smem>>
    %198 = vector.broadcast %197 : f32 to vector<8x128xf32>
    %199 = arith.addf %196, %198 : vector<8x128xf32>
    %cst_51 = arith.constant 0.000000e+00 : f32
    %200 = vector.broadcast %cst_51 : f32 to vector<8x128xf32>
    %201 = arith.maximumf %199, %200 : vector<8x128xf32>
    %c16_52 = arith.constant 16 : index
    %202 = memref.load %arg3[%c16_52] : memref<32xf32, #tpu.memory_space<smem>>
    %203 = vector.broadcast %202 : f32 to vector<8x128xf32>
    %204 = arith.mulf %201, %203 : vector<8x128xf32>
    %205 = arith.addf %193, %204 : vector<8x128xf32>
    %c17 = arith.constant 17 : index
    %206 = memref.load %arg1[%c17] : memref<32xf32, #tpu.memory_space<smem>>
    %207 = vector.broadcast %206 : f32 to vector<8x128xf32>
    %208 = arith.mulf %0, %207 : vector<8x128xf32>
    %c17_53 = arith.constant 17 : index
    %209 = memref.load %arg2[%c17_53] : memref<32xf32, #tpu.memory_space<smem>>
    %210 = vector.broadcast %209 : f32 to vector<8x128xf32>
    %211 = arith.addf %208, %210 : vector<8x128xf32>
    %cst_54 = arith.constant 0.000000e+00 : f32
    %212 = vector.broadcast %cst_54 : f32 to vector<8x128xf32>
    %213 = arith.maximumf %211, %212 : vector<8x128xf32>
    %c17_55 = arith.constant 17 : index
    %214 = memref.load %arg3[%c17_55] : memref<32xf32, #tpu.memory_space<smem>>
    %215 = vector.broadcast %214 : f32 to vector<8x128xf32>
    %216 = arith.mulf %213, %215 : vector<8x128xf32>
    %217 = arith.addf %205, %216 : vector<8x128xf32>
    %c18 = arith.constant 18 : index
    %218 = memref.load %arg1[%c18] : memref<32xf32, #tpu.memory_space<smem>>
    %219 = vector.broadcast %218 : f32 to vector<8x128xf32>
    %220 = arith.mulf %0, %219 : vector<8x128xf32>
    %c18_56 = arith.constant 18 : index
    %221 = memref.load %arg2[%c18_56] : memref<32xf32, #tpu.memory_space<smem>>
    %222 = vector.broadcast %221 : f32 to vector<8x128xf32>
    %223 = arith.addf %220, %222 : vector<8x128xf32>
    %cst_57 = arith.constant 0.000000e+00 : f32
    %224 = vector.broadcast %cst_57 : f32 to vector<8x128xf32>
    %225 = arith.maximumf %223, %224 : vector<8x128xf32>
    %c18_58 = arith.constant 18 : index
    %226 = memref.load %arg3[%c18_58] : memref<32xf32, #tpu.memory_space<smem>>
    %227 = vector.broadcast %226 : f32 to vector<8x128xf32>
    %228 = arith.mulf %225, %227 : vector<8x128xf32>
    %229 = arith.addf %217, %228 : vector<8x128xf32>
    %c19 = arith.constant 19 : index
    %230 = memref.load %arg1[%c19] : memref<32xf32, #tpu.memory_space<smem>>
    %231 = vector.broadcast %230 : f32 to vector<8x128xf32>
    %232 = arith.mulf %0, %231 : vector<8x128xf32>
    %c19_59 = arith.constant 19 : index
    %233 = memref.load %arg2[%c19_59] : memref<32xf32, #tpu.memory_space<smem>>
    %234 = vector.broadcast %233 : f32 to vector<8x128xf32>
    %235 = arith.addf %232, %234 : vector<8x128xf32>
    %cst_60 = arith.constant 0.000000e+00 : f32
    %236 = vector.broadcast %cst_60 : f32 to vector<8x128xf32>
    %237 = arith.maximumf %235, %236 : vector<8x128xf32>
    %c19_61 = arith.constant 19 : index
    %238 = memref.load %arg3[%c19_61] : memref<32xf32, #tpu.memory_space<smem>>
    %239 = vector.broadcast %238 : f32 to vector<8x128xf32>
    %240 = arith.mulf %237, %239 : vector<8x128xf32>
    %241 = arith.addf %229, %240 : vector<8x128xf32>
    %c20 = arith.constant 20 : index
    %242 = memref.load %arg1[%c20] : memref<32xf32, #tpu.memory_space<smem>>
    %243 = vector.broadcast %242 : f32 to vector<8x128xf32>
    %244 = arith.mulf %0, %243 : vector<8x128xf32>
    %c20_62 = arith.constant 20 : index
    %245 = memref.load %arg2[%c20_62] : memref<32xf32, #tpu.memory_space<smem>>
    %246 = vector.broadcast %245 : f32 to vector<8x128xf32>
    %247 = arith.addf %244, %246 : vector<8x128xf32>
    %cst_63 = arith.constant 0.000000e+00 : f32
    %248 = vector.broadcast %cst_63 : f32 to vector<8x128xf32>
    %249 = arith.maximumf %247, %248 : vector<8x128xf32>
    %c20_64 = arith.constant 20 : index
    %250 = memref.load %arg3[%c20_64] : memref<32xf32, #tpu.memory_space<smem>>
    %251 = vector.broadcast %250 : f32 to vector<8x128xf32>
    %252 = arith.mulf %249, %251 : vector<8x128xf32>
    %253 = arith.addf %241, %252 : vector<8x128xf32>
    %c21 = arith.constant 21 : index
    %254 = memref.load %arg1[%c21] : memref<32xf32, #tpu.memory_space<smem>>
    %255 = vector.broadcast %254 : f32 to vector<8x128xf32>
    %256 = arith.mulf %0, %255 : vector<8x128xf32>
    %c21_65 = arith.constant 21 : index
    %257 = memref.load %arg2[%c21_65] : memref<32xf32, #tpu.memory_space<smem>>
    %258 = vector.broadcast %257 : f32 to vector<8x128xf32>
    %259 = arith.addf %256, %258 : vector<8x128xf32>
    %cst_66 = arith.constant 0.000000e+00 : f32
    %260 = vector.broadcast %cst_66 : f32 to vector<8x128xf32>
    %261 = arith.maximumf %259, %260 : vector<8x128xf32>
    %c21_67 = arith.constant 21 : index
    %262 = memref.load %arg3[%c21_67] : memref<32xf32, #tpu.memory_space<smem>>
    %263 = vector.broadcast %262 : f32 to vector<8x128xf32>
    %264 = arith.mulf %261, %263 : vector<8x128xf32>
    %265 = arith.addf %253, %264 : vector<8x128xf32>
    %c22 = arith.constant 22 : index
    %266 = memref.load %arg1[%c22] : memref<32xf32, #tpu.memory_space<smem>>
    %267 = vector.broadcast %266 : f32 to vector<8x128xf32>
    %268 = arith.mulf %0, %267 : vector<8x128xf32>
    %c22_68 = arith.constant 22 : index
    %269 = memref.load %arg2[%c22_68] : memref<32xf32, #tpu.memory_space<smem>>
    %270 = vector.broadcast %269 : f32 to vector<8x128xf32>
    %271 = arith.addf %268, %270 : vector<8x128xf32>
    %cst_69 = arith.constant 0.000000e+00 : f32
    %272 = vector.broadcast %cst_69 : f32 to vector<8x128xf32>
    %273 = arith.maximumf %271, %272 : vector<8x128xf32>
    %c22_70 = arith.constant 22 : index
    %274 = memref.load %arg3[%c22_70] : memref<32xf32, #tpu.memory_space<smem>>
    %275 = vector.broadcast %274 : f32 to vector<8x128xf32>
    %276 = arith.mulf %273, %275 : vector<8x128xf32>
    %277 = arith.addf %265, %276 : vector<8x128xf32>
    %c23 = arith.constant 23 : index
    %278 = memref.load %arg1[%c23] : memref<32xf32, #tpu.memory_space<smem>>
    %279 = vector.broadcast %278 : f32 to vector<8x128xf32>
    %280 = arith.mulf %0, %279 : vector<8x128xf32>
    %c23_71 = arith.constant 23 : index
    %281 = memref.load %arg2[%c23_71] : memref<32xf32, #tpu.memory_space<smem>>
    %282 = vector.broadcast %281 : f32 to vector<8x128xf32>
    %283 = arith.addf %280, %282 : vector<8x128xf32>
    %cst_72 = arith.constant 0.000000e+00 : f32
    %284 = vector.broadcast %cst_72 : f32 to vector<8x128xf32>
    %285 = arith.maximumf %283, %284 : vector<8x128xf32>
    %c23_73 = arith.constant 23 : index
    %286 = memref.load %arg3[%c23_73] : memref<32xf32, #tpu.memory_space<smem>>
    %287 = vector.broadcast %286 : f32 to vector<8x128xf32>
    %288 = arith.mulf %285, %287 : vector<8x128xf32>
    %289 = arith.addf %277, %288 : vector<8x128xf32>
    %c24 = arith.constant 24 : index
    %290 = memref.load %arg1[%c24] : memref<32xf32, #tpu.memory_space<smem>>
    %291 = vector.broadcast %290 : f32 to vector<8x128xf32>
    %292 = arith.mulf %0, %291 : vector<8x128xf32>
    %c24_74 = arith.constant 24 : index
    %293 = memref.load %arg2[%c24_74] : memref<32xf32, #tpu.memory_space<smem>>
    %294 = vector.broadcast %293 : f32 to vector<8x128xf32>
    %295 = arith.addf %292, %294 : vector<8x128xf32>
    %cst_75 = arith.constant 0.000000e+00 : f32
    %296 = vector.broadcast %cst_75 : f32 to vector<8x128xf32>
    %297 = arith.maximumf %295, %296 : vector<8x128xf32>
    %c24_76 = arith.constant 24 : index
    %298 = memref.load %arg3[%c24_76] : memref<32xf32, #tpu.memory_space<smem>>
    %299 = vector.broadcast %298 : f32 to vector<8x128xf32>
    %300 = arith.mulf %297, %299 : vector<8x128xf32>
    %301 = arith.addf %289, %300 : vector<8x128xf32>
    %c25 = arith.constant 25 : index
    %302 = memref.load %arg1[%c25] : memref<32xf32, #tpu.memory_space<smem>>
    %303 = vector.broadcast %302 : f32 to vector<8x128xf32>
    %304 = arith.mulf %0, %303 : vector<8x128xf32>
    %c25_77 = arith.constant 25 : index
    %305 = memref.load %arg2[%c25_77] : memref<32xf32, #tpu.memory_space<smem>>
    %306 = vector.broadcast %305 : f32 to vector<8x128xf32>
    %307 = arith.addf %304, %306 : vector<8x128xf32>
    %cst_78 = arith.constant 0.000000e+00 : f32
    %308 = vector.broadcast %cst_78 : f32 to vector<8x128xf32>
    %309 = arith.maximumf %307, %308 : vector<8x128xf32>
    %c25_79 = arith.constant 25 : index
    %310 = memref.load %arg3[%c25_79] : memref<32xf32, #tpu.memory_space<smem>>
    %311 = vector.broadcast %310 : f32 to vector<8x128xf32>
    %312 = arith.mulf %309, %311 : vector<8x128xf32>
    %313 = arith.addf %301, %312 : vector<8x128xf32>
    %c26 = arith.constant 26 : index
    %314 = memref.load %arg1[%c26] : memref<32xf32, #tpu.memory_space<smem>>
    %315 = vector.broadcast %314 : f32 to vector<8x128xf32>
    %316 = arith.mulf %0, %315 : vector<8x128xf32>
    %c26_80 = arith.constant 26 : index
    %317 = memref.load %arg2[%c26_80] : memref<32xf32, #tpu.memory_space<smem>>
    %318 = vector.broadcast %317 : f32 to vector<8x128xf32>
    %319 = arith.addf %316, %318 : vector<8x128xf32>
    %cst_81 = arith.constant 0.000000e+00 : f32
    %320 = vector.broadcast %cst_81 : f32 to vector<8x128xf32>
    %321 = arith.maximumf %319, %320 : vector<8x128xf32>
    %c26_82 = arith.constant 26 : index
    %322 = memref.load %arg3[%c26_82] : memref<32xf32, #tpu.memory_space<smem>>
    %323 = vector.broadcast %322 : f32 to vector<8x128xf32>
    %324 = arith.mulf %321, %323 : vector<8x128xf32>
    %325 = arith.addf %313, %324 : vector<8x128xf32>
    %c27 = arith.constant 27 : index
    %326 = memref.load %arg1[%c27] : memref<32xf32, #tpu.memory_space<smem>>
    %327 = vector.broadcast %326 : f32 to vector<8x128xf32>
    %328 = arith.mulf %0, %327 : vector<8x128xf32>
    %c27_83 = arith.constant 27 : index
    %329 = memref.load %arg2[%c27_83] : memref<32xf32, #tpu.memory_space<smem>>
    %330 = vector.broadcast %329 : f32 to vector<8x128xf32>
    %331 = arith.addf %328, %330 : vector<8x128xf32>
    %cst_84 = arith.constant 0.000000e+00 : f32
    %332 = vector.broadcast %cst_84 : f32 to vector<8x128xf32>
    %333 = arith.maximumf %331, %332 : vector<8x128xf32>
    %c27_85 = arith.constant 27 : index
    %334 = memref.load %arg3[%c27_85] : memref<32xf32, #tpu.memory_space<smem>>
    %335 = vector.broadcast %334 : f32 to vector<8x128xf32>
    %336 = arith.mulf %333, %335 : vector<8x128xf32>
    %337 = arith.addf %325, %336 : vector<8x128xf32>
    %c28 = arith.constant 28 : index
    %338 = memref.load %arg1[%c28] : memref<32xf32, #tpu.memory_space<smem>>
    %339 = vector.broadcast %338 : f32 to vector<8x128xf32>
    %340 = arith.mulf %0, %339 : vector<8x128xf32>
    %c28_86 = arith.constant 28 : index
    %341 = memref.load %arg2[%c28_86] : memref<32xf32, #tpu.memory_space<smem>>
    %342 = vector.broadcast %341 : f32 to vector<8x128xf32>
    %343 = arith.addf %340, %342 : vector<8x128xf32>
    %cst_87 = arith.constant 0.000000e+00 : f32
    %344 = vector.broadcast %cst_87 : f32 to vector<8x128xf32>
    %345 = arith.maximumf %343, %344 : vector<8x128xf32>
    %c28_88 = arith.constant 28 : index
    %346 = memref.load %arg3[%c28_88] : memref<32xf32, #tpu.memory_space<smem>>
    %347 = vector.broadcast %346 : f32 to vector<8x128xf32>
    %348 = arith.mulf %345, %347 : vector<8x128xf32>
    %349 = arith.addf %337, %348 : vector<8x128xf32>
    %c29 = arith.constant 29 : index
    %350 = memref.load %arg1[%c29] : memref<32xf32, #tpu.memory_space<smem>>
    %351 = vector.broadcast %350 : f32 to vector<8x128xf32>
    %352 = arith.mulf %0, %351 : vector<8x128xf32>
    %c29_89 = arith.constant 29 : index
    %353 = memref.load %arg2[%c29_89] : memref<32xf32, #tpu.memory_space<smem>>
    %354 = vector.broadcast %353 : f32 to vector<8x128xf32>
    %355 = arith.addf %352, %354 : vector<8x128xf32>
    %cst_90 = arith.constant 0.000000e+00 : f32
    %356 = vector.broadcast %cst_90 : f32 to vector<8x128xf32>
    %357 = arith.maximumf %355, %356 : vector<8x128xf32>
    %c29_91 = arith.constant 29 : index
    %358 = memref.load %arg3[%c29_91] : memref<32xf32, #tpu.memory_space<smem>>
    %359 = vector.broadcast %358 : f32 to vector<8x128xf32>
    %360 = arith.mulf %357, %359 : vector<8x128xf32>
    %361 = arith.addf %349, %360 : vector<8x128xf32>
    %c30 = arith.constant 30 : index
    %362 = memref.load %arg1[%c30] : memref<32xf32, #tpu.memory_space<smem>>
    %363 = vector.broadcast %362 : f32 to vector<8x128xf32>
    %364 = arith.mulf %0, %363 : vector<8x128xf32>
    %c30_92 = arith.constant 30 : index
    %365 = memref.load %arg2[%c30_92] : memref<32xf32, #tpu.memory_space<smem>>
    %366 = vector.broadcast %365 : f32 to vector<8x128xf32>
    %367 = arith.addf %364, %366 : vector<8x128xf32>
    %cst_93 = arith.constant 0.000000e+00 : f32
    %368 = vector.broadcast %cst_93 : f32 to vector<8x128xf32>
    %369 = arith.maximumf %367, %368 : vector<8x128xf32>
    %c30_94 = arith.constant 30 : index
    %370 = memref.load %arg3[%c30_94] : memref<32xf32, #tpu.memory_space<smem>>
    %371 = vector.broadcast %370 : f32 to vector<8x128xf32>
    %372 = arith.mulf %369, %371 : vector<8x128xf32>
    %373 = arith.addf %361, %372 : vector<8x128xf32>
    %c31 = arith.constant 31 : index
    %374 = memref.load %arg1[%c31] : memref<32xf32, #tpu.memory_space<smem>>
    %375 = vector.broadcast %374 : f32 to vector<8x128xf32>
    %376 = arith.mulf %0, %375 : vector<8x128xf32>
    %c31_95 = arith.constant 31 : index
    %377 = memref.load %arg2[%c31_95] : memref<32xf32, #tpu.memory_space<smem>>
    %378 = vector.broadcast %377 : f32 to vector<8x128xf32>
    %379 = arith.addf %376, %378 : vector<8x128xf32>
    %cst_96 = arith.constant 0.000000e+00 : f32
    %380 = vector.broadcast %cst_96 : f32 to vector<8x128xf32>
    %381 = arith.maximumf %379, %380 : vector<8x128xf32>
    %c31_97 = arith.constant 31 : index
    %382 = memref.load %arg3[%c31_97] : memref<32xf32, #tpu.memory_space<smem>>
    %383 = vector.broadcast %382 : f32 to vector<8x128xf32>
    %384 = arith.mulf %381, %383 : vector<8x128xf32>
    %385 = arith.addf %373, %384 : vector<8x128xf32>
    %c0_98 = arith.constant 0 : index
    %386 = memref.load %arg4[%c0_98] : memref<1xf32, #tpu.memory_space<smem>>
    %387 = vector.broadcast %386 : f32 to vector<8x128xf32>
    %388 = arith.addf %385, %387 : vector<8x128xf32>
    %c0_99 = arith.constant 0 : index
    %c0_100 = arith.constant 0 : index
    %389 = vector.load %arg6[%c0_99, %c0_100] : memref<8x128xf32, #tpu.memory_space<vmem>>, vector<8x128xf32>
    tpu.vector_store %arg6[%c0_99, %c0_100], %388 {strides = array<i32>} : memref<8x128xf32, #tpu.memory_space<vmem>>, vector<8x128xf32>,
    return
  }
  func.func @transform_0(%arg0: i32) -> i32 {
    %c0_i32 = arith.constant 0 : i32
    %c0_i32_0 = arith.constant 0 : i32
    return %c0_i32 : i32
  }
  func.func @transform_1(%arg0: i32) -> i32 {
    %c0_i32 = arith.constant 0 : i32
    %c0_i32_0 = arith.constant 0 : i32
    return %c0_i32 : i32
  }
  func.func @transform_2(%arg0: i32) -> i32 {
    %c0_i32 = arith.constant 0 : i32
    %c0_i32_0 = arith.constant 0 : i32
    return %c0_i32 : i32
  }
  func.func @transform_3(%arg0: i32) -> i32 {
    %c0_i32 = arith.constant 0 : i32
    %c0_i32_0 = arith.constant 0 : i32
    return %c0_i32 : i32
  }
  func.func @transform_4(%arg0: i32) -> (i32, i32) {
    %c0_i32 = arith.constant 0 : i32
    %c0_i32_0 = arith.constant 0 : i32
    return %arg0, %c0_i32 : i32, i32
  }
  func.func @transform_5(%arg0: i32) -> (i32, i32) {
    %c0_i32 = arith.constant 0 : i32
    %c0_i32_0 = arith.constant 0 : i32
    return %arg0, %c0_i32 : i32, i32
  }
}

</mosaic_0001>

<bundles_post_ra>
// kernel: tpu_custom_call.1
= control target key start
LH: loop header
LB: loop body
LE: loop exit
PB: predicated region body
PF: predicated region fallthrough
CT: control target
= control target key end

     0   :  { %11 = vsyncpa [#allocation5], 0  ;;  %s957_s0 = inlined_call_operand.vmem [shape: f32[32], index: 0, kind: input, shape index: {}]   ;;  %s958_s1 = inlined_call_operand.vmem [shape: f32[32], index: 1, kind: input, shape index: {}]   ;;  %s959_s2 = inlined_call_operand.vmem [shape: f32[32], index: 2, kind: input, shape index: {}]   ;;  %s960_s3 = inlined_call_operand.<no memory space> [shape: f32[1], index: 3, kind: input, shape index: {}]   ;;  %s961_s4 = inlined_call_operand.vmem [shape: f32[8,128], index: 4, kind: input, shape index: {}]   ;;  %s962_s5 = inlined_call_operand.hbm [shape: f32[8,128], index: 5, kind: output, shape index: {}]  }
   0x1   :  { %12 = vsyncpa [#allocation7], 0  ;;  %s30_s20 = sshll.u32 %s958_s1, 4  ;;  %s31_s20 = int_to_ptr.vmem [resolvable:$true] %s30_s20 }
   0x2   :  { %13 = vsyncpa [#allocation4], 0  ;;  %s20_s23 = sshll.u32 %s957_s0, 4  ;;  %s528_s24 = scalar_lea.vmem %s31_s20, 16  ;;  %s21_s23 = int_to_ptr.vmem [resolvable:$true] %s20_s23 }
   0x3   :  { %p529_p0 = scmp.ne.s32.totalorder %s31_s20, %s528_s24  ;;  %p533_p1 = scmp.lt.s32.totalorder %s31_s20, %s31_s20 }
   0x4   :  { %p534_p2 = scmp.lt.s32.totalorder %s528_s24, %s528_s24 }
   0x6   :  { %p535_p3 = por %p534_p2, %p533_p1 }
   0x8   :  { %p536_p4 = pnand %p535_p3, %p529_p0 }
   0xa   :  { %539 = shalt.err (!%p536_p4)
}
   0xb   :  { %s592_s25 = smov [#allocation6]   ;;  %s540_s26 = scalar_lea.vmem %s21_s23, 16 }
   0xc   :  { %33 = dma.vmem_to_smem %s31_s20, 16, %s592_s25, [#allocation7]  }
   0xd   :  { %p541_p5 = scmp.ne.s32.totalorder %s21_s23, %s540_s26  ;;  %p545_p6 = scmp.lt.s32.totalorder %s21_s23, %s21_s23 }
   0xe   :  { %p546_p7 = scmp.lt.s32.totalorder %s540_s26, %s540_s26 }
  0x10   :  { %p547_p8 = por %p546_p7, %p545_p6 }
  0x12   :  { %p548_p9 = pnand %p547_p8, %p541_p5 }
  0x14   :  { %551 = shalt.err (!%p548_p9)
}
  0x15   :  { %s593_s1 = smov [#allocation3]   ;;  %s40_s28 = sshll.u32 %s959_s2, 4  ;;  %s41_s28 = int_to_ptr.vmem [resolvable:$true] %s40_s28 }
  0x16   :  { %23 = dma.vmem_to_smem %s21_s23, 16, %s593_s1, [#allocation5]  }
  0x17   :  { %s552_s29 = scalar_lea.vmem %s41_s28, 16  ;;  %p557_p11 = scmp.lt.s32.totalorder %s41_s28, %s41_s28 }
  0x18   :  { %p553_p10 = scmp.ne.s32.totalorder %s41_s28, %s552_s29  ;;  %p558_p12 = scmp.lt.s32.totalorder %s552_s29, %s552_s29 }
  0x1a   :  { %p559_p13 = por %p558_p12, %p557_p11 }
  0x1c   :  { %p560_p0 = pnand %p559_p13, %p553_p10 }
  0x1e   :  { %563 = shalt.err (!%p560_p0)
}
  0x1f   :  { %s594_s30 = smov [#allocation8]  }
  0x20   :  { %43 = dma.vmem_to_smem %s41_s28, 16, %s594_s30, [#allocation7]  }
  0x21   :  { %586 = dma.done.wait [#allocation5], 16  }
  0x22   :  { %587 = vsyncadd [#allocation5], 4294967280 }
  0x23   :  { %588 = dma.done.wait [#allocation7], 32  }
  0x24   :  { %589 = vsyncadd [#allocation7], 4294967264 }
  0x25   :  { %57 = sfence }
  0x26   :  { %s59_s6 = sld [smem:[#allocation3]]  ;;  %s431_s2 = sld [smem:[#allocation3 + $0x1]]  ;;  %v644_v0 = vld [vmem:[%s961_s4] sm:$0xff] }
  0x27   :  { %s62_s7 = sld [smem:[#allocation6]]  ;;  %s432_s9 = sld [smem:[#allocation6 + $0x1]] }
  0x28   :  { %s635_s8 = sld [smem:[#allocation8]]  ;;  %s637_s10 = sld [smem:[#allocation8 + $0x1]] }
  0x29   :  { %s434_s11 = sld [smem:[#allocation3 + $0x2]]  ;;  %s437_s16 = sld [smem:[#allocation3 + $0x3]] }
  0x2a   :  { %s639_s12 = sld [smem:[#allocation6 + $0x2]]  ;;  %s648_s17 = sld [smem:[#allocation6 + $0x3]] }
  0x2b   :  { %s646_s15 = sld [smem:[#allocation8 + $0x2]]  ;;  %s650_s18 = sld [smem:[#allocation8 + $0x3]] }
  0x2c   :  { %v60_v1 = vstv %s59_s6  ;;  %s652_s19 = sld [smem:[#allocation3 + $0x4]]  ;;  %v71_v4 = vstv %s431_s2  ;;  %s659_s21 = sld [smem:[#allocation3 + $0x5]] }
  0x2d   :  { %v63_v2 = vstv %s62_s7  ;;  %s654_s20 = sld [smem:[#allocation6 + $0x4]]  ;;  %v61_v3 = vmul.f32 %v60_v1, %v644_v0  ;;  %v72_v5 = vmul.f32 %v71_v4, %v644_v0  ;;  %v74_v6 = vstv %s432_s9  ;;  %s662_s22 = sld [smem:[#allocation6 + $0x5]] }
  0x2e   :  { %s657_s4 = sld [smem:[#allocation8 + $0x4]]  ;;  %v67_v8 = vstv %s635_s8  ;;  %s666_s23 = sld [smem:[#allocation3 + $0x6]]  ;;  %v78_v12 = vstv %s637_s10 }
  0x2f   :  { %v64_v7 = vadd.f32 %v63_v2, %v61_v3  ;;  %v82_v9 = vstv %s434_s11  ;;  %s668_s24 = sld [smem:[#allocation6 + $0x6]]  ;;  %v75_v11 = vadd.f32 %v74_v6, %v72_v5  ;;  %v93_v14 = vstv %s437_s16  ;;  %s672_s25 = sld [smem:[#allocation8 + $0x5]] }
  0x30   :  { %v85_v10 = vstv %s639_s12  ;;  %v83_v13 = vmul.f32 %v82_v9, %v644_v0  ;;  %s674_s26 = sld [smem:[#allocation3 + $0x7]]  ;;  %v94_v17 = vmul.f32 %v93_v14, %v644_v0  ;;  %v96_v18 = vstv %s648_s17  ;;  %s679_s1 = sld [smem:[#allocation8 + $0x6]] }
  0x31   :  { %v65_v15 = vmax.f32 %v64_v7, 0.0  ;;  %v89_v16 = vstv %s646_s15  ;;  %s681_s0 = sld [smem:[#allocation6 + $0x7]]  ;;  %v76_v19 = vmax.f32 %v75_v11, 0.0  ;;  %s685_s27 = sld [smem:[#allocation3 + $0x8]]  ;;  %v100_v25 = vstv %s650_s18 }
  0x32   :  { %v86_v20 = vadd.f32 %v85_v10, %v83_v13  ;;  %v104_v21 = vstv %s652_s19  ;;  %s687_s28 = sld [smem:[#allocation6 + $0x8]]  ;;  %v97_v24 = vadd.f32 %v96_v18, %v94_v17  ;;  %s691_s29 = sld [smem:[#allocation8 + $0x7]]  ;;  %v115_v29 = vstv %s659_s21 }
  0x33   :  { %v107_v22 = vstv %s654_s20  ;;  %v68_v23 = vmul.f32 %v67_v8, %v65_v15  ;;  %v105_v26 = vmul.f32 %v104_v21, %v644_v0  ;;  %v79_v27 = vmul.f32 %v78_v12, %v76_v19  ;;  %s695_s30 = sld [smem:[#allocation3 + $0x9]]  ;;  %s701_s7 = sld [smem:[#allocation8 + $0x8]] }
  0x34   :  { %v87_v28 = vmax.f32 %v86_v20, 0.0  ;;  %v118_v30 = vstv %s662_s22  ;;  %s697_s6 = sld [smem:[#allocation6 + $0x9]]  ;;  %v98_v31 = vmax.f32 %v97_v24, 0.0  ;;  %v111_v33 = vstv %s657_s4  ;;  %s705_s8 = sld [smem:[#allocation3 + $0xa]] }
  0x35   :  { %v108_v32 = vadd.f32 %v107_v22, %v105_v26  ;;  %v116_v34 = vmul.f32 %v115_v29, %v644_v0  ;;  %v80_v35 = vadd.f32 %v79_v27, %v68_v23  ;;  %v126_v37 = vstv %s666_s23  ;;  %s707_s2 = sld [smem:[#allocation6 + $0xa]]  ;;  %s710_s9 = sld [smem:[#allocation8 + $0x9]] }
  0x36   :  { %v90_v36 = vmul.f32 %v89_v16, %v87_v28  ;;  %v129_v38 = vstv %s668_s24  ;;  %v101_v39 = vmul.f32 %v100_v25, %v98_v31  ;;  %v127_v42 = vmul.f32 %v126_v37, %v644_v0  ;;  %s715_s10 = sld [smem:[#allocation3 + $0xb]]  ;;  %s720_s12 = sld [smem:[#allocation8 + $0xa]] }
  0x37   :  { %v109_v40 = vmax.f32 %v108_v32, 0.0  ;;  %v119_v41 = vadd.f32 %v118_v30, %v116_v34  ;;  %v122_v44 = vstv %s672_s25  ;;  %v137_v45 = vstv %s674_s26  ;;  %s717_s11 = sld [smem:[#allocation6 + $0xb]]  ;;  %s725_s13 = sld [smem:[#allocation3 + $0xc]] }
  0x38   :  { %v91_v43 = vadd.f32 %v90_v36, %v80_v35  ;;  %v140_v46 = vstv %s681_s0  ;;  %v130_v49 = vadd.f32 %v129_v38, %v127_v42  ;;  %v138_v50 = vmul.f32 %v137_v45, %v644_v0  ;;  %s727_s14 = sld [smem:[#allocation6 + $0xc]]  ;;  %s730_s15 = sld [smem:[#allocation8 + $0xb]] }
  0x39   :  { %v112_v47 = vmul.f32 %v111_v33, %v109_v40  ;;  %v120_v48 = vmax.f32 %v119_v41, 0.0  ;;  %v133_v52 = vstv %s679_s1  ;;  %v148_v53 = vstv %s685_s27  ;;  %s735_s16 = sld [smem:[#allocation3 + $0xd]]  ;;  %s740_s18 = sld [smem:[#allocation8 + $0xc]] }
  0x3a   :  { %v102_v51 = vadd.f32 %v101_v39, %v91_v43  ;;  %v151_v54 = vstv %s687_s28  ;;  %v131_v56 = vmax.f32 %v130_v49, 0.0  ;;  %v141_v57 = vadd.f32 %v140_v46, %v138_v50  ;;  %s737_s17 = sld [smem:[#allocation6 + $0xd]]  ;;  %s745_s19 = sld [smem:[#allocation3 + $0xe]] }
  0x3b   :  { %v123_v55 = vmul.f32 %v122_v44, %v120_v48  ;;  %v149_v58 = vmul.f32 %v148_v53, %v644_v0  ;;  %v144_v60 = vstv %s691_s29  ;;  %v159_v61 = vstv %s695_s30  ;;  %s747_s20 = sld [smem:[#allocation6 + $0xe]]  ;;  %s750_s4 = sld [smem:[#allocation8 + $0xd]] }
  0x3c   :  { %v113_v59 = vadd.f32 %v112_v47, %v102_v51  ;;  %v162_v62 = vstv %s697_s6  ;;  %v134_v63 = vmul.f32 %v133_v52, %v131_v56  ;;  %v142_v1 = vmax.f32 %v141_v57, 0.0  ;;  %s755_s21 = sld [smem:[#allocation3 + $0xf]]  ;;  %s760_s23 = sld [smem:[#allocation8 + $0xe]] }
  0x3d   :  { %v152_v2 = vadd.f32 %v151_v54, %v149_v58  ;;  %v160_v3 = vmul.f32 %v159_v61, %v644_v0  ;;  %v155_v5 = vstv %s701_s7  ;;  %v170_v6 = vstv %s705_s8  ;;  %s757_s22 = sld [smem:[#allocation6 + $0xf]]  ;;  %s765_s24 = sld [smem:[#allocation3 + $0x10]] }
  0x3e   :  { %v124_v4 = vadd.f32 %v123_v55, %v113_v59  ;;  %v173_v7 = vstv %s707_s2  ;;  %v145_v8 = vmul.f32 %v144_v60, %v142_v1  ;;  %v171_v11 = vmul.f32 %v170_v6, %v644_v0  ;;  %s767_s25 = sld [smem:[#allocation6 + $0x10]]  ;;  %s770_s26 = sld [smem:[#allocation8 + $0xf]] }
  0x3f   :  { %v153_v9 = vmax.f32 %v152_v2, 0.0  ;;  %v163_v10 = vadd.f32 %v162_v62, %v160_v3  ;;  %v166_v13 = vstv %s710_s9  ;;  %v181_v14 = vstv %s715_s10  ;;  %s775_s1 = sld [smem:[#allocation3 + $0x11]]  ;;  %s780_s27 = sld [smem:[#allocation8 + $0x10]] }
  0x40   :  { %v135_v12 = vadd.f32 %v134_v63, %v124_v4  ;;  %v184_v15 = vstv %s717_s11  ;;  %v174_v18 = vadd.f32 %v173_v7, %v171_v11  ;;  %v182_v19 = vmul.f32 %v181_v14, %v644_v0  ;;  %s777_s0 = sld [smem:[#allocation6 + $0x11]]  ;;  %s785_s28 = sld [smem:[#allocation3 + $0x12]] }
  0x41   :  { %v156_v16 = vmul.f32 %v155_v5, %v153_v9  ;;  %v164_v17 = vmax.f32 %v163_v10, 0.0  ;;  %v177_v21 = vstv %s720_s12  ;;  %v192_v22 = vstv %s725_s13  ;;  %s787_s29 = sld [smem:[#allocation6 + $0x12]]  ;;  %s790_s30 = sld [smem:[#allocation8 + $0x11]] }
  0x42   :  { %v146_v20 = vadd.f32 %v145_v8, %v135_v12  ;;  %v195_v23 = vstv %s727_s14  ;;  %v175_v25 = vmax.f32 %v174_v18, 0.0  ;;  %v185_v26 = vadd.f32 %v184_v15, %v182_v19  ;;  %s795_s6 = sld [smem:[#allocation3 + $0x13]]  ;;  %s800_s8 = sld [smem:[#allocation8 + $0x12]] }
  0x43   :  { %v167_v24 = vmul.f32 %v166_v13, %v164_v17  ;;  %v193_v27 = vmul.f32 %v192_v22, %v644_v0  ;;  %v188_v29 = vstv %s730_s15  ;;  %v203_v30 = vstv %s735_s16  ;;  %s797_s7 = sld [smem:[#allocation6 + $0x13]]  ;;  %s805_s2 = sld [smem:[#allocation3 + $0x14]] }
  0x44   :  { %v157_v28 = vadd.f32 %v156_v16, %v146_v20  ;;  %v206_v31 = vstv %s737_s17  ;;  %v178_v32 = vmul.f32 %v177_v21, %v175_v25  ;;  %v186_v33 = vmax.f32 %v185_v26, 0.0  ;;  %s807_s9 = sld [smem:[#allocation6 + $0x14]]  ;;  %s810_s10 = sld [smem:[#allocation8 + $0x13]] }
  0x45   :  { %v196_v34 = vadd.f32 %v195_v23, %v193_v27  ;;  %v204_v35 = vmul.f32 %v203_v30, %v644_v0  ;;  %v199_v37 = vstv %s740_s18  ;;  %v214_v38 = vstv %s745_s19  ;;  %s815_s11 = sld [smem:[#allocation3 + $0x15]]  ;;  %s820_s13 = sld [smem:[#allocation8 + $0x14]] }
  0x46   :  { %v168_v36 = vadd.f32 %v167_v24, %v157_v28  ;;  %v217_v39 = vstv %s747_s20  ;;  %v189_v40 = vmul.f32 %v188_v29, %v186_v33  ;;  %v215_v43 = vmul.f32 %v214_v38, %v644_v0  ;;  %s817_s12 = sld [smem:[#allocation6 + $0x15]]  ;;  %s825_s14 = sld [smem:[#allocation3 + $0x16]] }
  0x47   :  { %v197_v41 = vmax.f32 %v196_v34, 0.0  ;;  %v207_v42 = vadd.f32 %v206_v31, %v204_v35  ;;  %v210_v45 = vstv %s750_s4  ;;  %v225_v46 = vstv %s755_s21  ;;  %s827_s15 = sld [smem:[#allocation6 + $0x16]]  ;;  %s830_s16 = sld [smem:[#allocation8 + $0x15]] }
  0x48   :  { %v179_v44 = vadd.f32 %v178_v32, %v168_v36  ;;  %v228_v47 = vstv %s757_s22  ;;  %v218_v50 = vadd.f32 %v217_v39, %v215_v43  ;;  %v226_v51 = vmul.f32 %v225_v46, %v644_v0  ;;  %s835_s17 = sld [smem:[#allocation3 + $0x17]]  ;;  %s840_s19 = sld [smem:[#allocation8 + $0x16]] }
  0x49   :  { %v200_v48 = vmul.f32 %v199_v37, %v197_v41  ;;  %v208_v49 = vmax.f32 %v207_v42, 0.0  ;;  %v221_v53 = vstv %s760_s23  ;;  %v236_v54 = vstv %s765_s24  ;;  %s837_s18 = sld [smem:[#allocation6 + $0x17]]  ;;  %s845_s20 = sld [smem:[#allocation3 + $0x18]] }
  0x4a   :  { %v190_v52 = vadd.f32 %v189_v40, %v179_v44  ;;  %v239_v55 = vstv %s767_s25  ;;  %v219_v57 = vmax.f32 %v218_v50, 0.0  ;;  %v229_v58 = vadd.f32 %v228_v47, %v226_v51  ;;  %s847_s4 = sld [smem:[#allocation6 + $0x18]]  ;;  %s850_s21 = sld [smem:[#allocation8 + $0x17]] }
  0x4b   :  { %v211_v56 = vmul.f32 %v210_v45, %v208_v49  ;;  %v237_v59 = vmul.f32 %v236_v54, %v644_v0  ;;  %v232_v61 = vstv %s770_s26  ;;  %v247_v62 = vstv %s775_s1  ;;  %s855_s22 = sld [smem:[#allocation3 + $0x19]]  ;;  %s860_s24 = sld [smem:[#allocation8 + $0x18]] }
  0x4c   :  { %v201_v60 = vadd.f32 %v200_v48, %v190_v52  ;;  %v250_v63 = vstv %s777_s0  ;;  %v222_v1 = vmul.f32 %v221_v53, %v219_v57  ;;  %v230_v2 = vmax.f32 %v229_v58, 0.0  ;;  %s857_s23 = sld [smem:[#allocation6 + $0x19]]  ;;  %s865_s25 = sld [smem:[#allocation3 + $0x1a]] }
  0x4d   :  { %v240_v3 = vadd.f32 %v239_v55, %v237_v59  ;;  %v248_v4 = vmul.f32 %v247_v62, %v644_v0  ;;  %v243_v6 = vstv %s780_s27  ;;  %v258_v7 = vstv %s785_s28  ;;  %s867_s26 = sld [smem:[#allocation6 + $0x1a]]  ;;  %s870_s1 = sld [smem:[#allocation8 + $0x19]] }
  0x4e   :  { %v212_v5 = vadd.f32 %v211_v56, %v201_v60  ;;  %v261_v8 = vstv %s787_s29  ;;  %v233_v9 = vmul.f32 %v232_v61, %v230_v2  ;;  %v259_v12 = vmul.f32 %v258_v7, %v644_v0  ;;  %s875_s0 = sld [smem:[#allocation3 + $0x1b]]  ;;  %s880_s28 = sld [smem:[#allocation8 + $0x1a]] }
  0x4f   :  { %v241_v10 = vmax.f32 %v240_v3, 0.0  ;;  %v251_v11 = vadd.f32 %v250_v63, %v248_v4  ;;  %v254_v14 = vstv %s790_s30  ;;  %v269_v15 = vstv %s795_s6  ;;  %s877_s27 = sld [smem:[#allocation6 + $0x1b]]  ;;  %s885_s29 = sld [smem:[#allocation3 + $0x1c]] }
  0x50   :  { %v223_v13 = vadd.f32 %v222_v1, %v212_v5  ;;  %v272_v16 = vstv %s797_s7  ;;  %v262_v19 = vadd.f32 %v261_v8, %v259_v12  ;;  %v270_v20 = vmul.f32 %v269_v15, %v644_v0  ;;  %s887_s30 = sld [smem:[#allocation6 + $0x1c]]  ;;  %s890_s6 = sld [smem:[#allocation8 + $0x1b]] }
  0x51   :  { %v244_v17 = vmul.f32 %v243_v6, %v241_v10  ;;  %v252_v18 = vmax.f32 %v251_v11, 0.0  ;;  %v265_v22 = vstv %s800_s8  ;;  %v280_v23 = vstv %s805_s2  ;;  %s895_s7 = sld [smem:[#allocation3 + $0x1d]]  ;;  %s900_s2 = sld [smem:[#allocation8 + $0x1c]] }
  0x52   :  { %v234_v21 = vadd.f32 %v233_v9, %v223_v13  ;;  %v283_v24 = vstv %s807_s9  ;;  %v263_v26 = vmax.f32 %v262_v19, 0.0  ;;  %v273_v27 = vadd.f32 %v272_v16, %v270_v20  ;;  %s897_s8 = sld [smem:[#allocation6 + $0x1d]]  ;;  %s905_s9 = sld [smem:[#allocation3 + $0x1e]] }
  0x53   :  { %v255_v25 = vmul.f32 %v254_v14, %v252_v18  ;;  %v281_v28 = vmul.f32 %v280_v23, %v644_v0  ;;  %v276_v30 = vstv %s810_s10  ;;  %v291_v31 = vstv %s815_s11  ;;  %s907_s10 = sld [smem:[#allocation6 + $0x1e]]  ;;  %s910_s11 = sld [smem:[#allocation8 + $0x1d]] }
  0x54   :  { %v245_v29 = vadd.f32 %v244_v17, %v234_v21  ;;  %v294_v32 = vstv %s817_s12  ;;  %v266_v33 = vmul.f32 %v265_v22, %v263_v26  ;;  %v274_v34 = vmax.f32 %v273_v27, 0.0  ;;  %s915_s12 = sld [smem:[#allocation3 + $0x1f]] }
  0x55   :  { %v284_v35 = vadd.f32 %v283_v24, %v281_v28  ;;  %v292_v36 = vmul.f32 %v291_v31, %v644_v0  ;;  %v287_v38 = vstv %s820_s13  ;;  %v302_v39 = vstv %s825_s14  ;;  %s917_s13 = sld [smem:[#allocation6 + $0x1f]]  ;;  %s923_s14 = sld [smem:[#allocation8 + $0x1e]] }
  0x56   :  { %v256_v37 = vadd.f32 %v255_v25, %v245_v29  ;;  %v305_v40 = vstv %s827_s15  ;;  %v277_v41 = vmul.f32 %v276_v30, %v274_v34  ;;  %v303_v44 = vmul.f32 %v302_v39, %v644_v0  ;;  %s929_s15 = sld [smem:[#allocation8 + $0x1f]] }
  0x57   :  { %v285_v42 = vmax.f32 %v284_v35, 0.0  ;;  %v295_v43 = vadd.f32 %v294_v32, %v292_v36  ;;  %v298_v46 = vstv %s830_s16  ;;  %v313_v47 = vstv %s835_s17 }
  0x58   :  { %v267_v45 = vadd.f32 %v266_v33, %v256_v37  ;;  %v316_v48 = vstv %s837_s18  ;;  %v306_v51 = vadd.f32 %v305_v40, %v303_v44  ;;  %v314_v52 = vmul.f32 %v313_v47, %v644_v0  ;;  %s595_s18 = smov [#allocation9]  }
  0x59   :  { %v288_v49 = vmul.f32 %v287_v38, %v285_v42  ;;  %v296_v50 = vmax.f32 %v295_v43, 0.0  ;;  %v309_v54 = vstv %s840_s19  ;;  %v324_v55 = vstv %s845_s20  ;;  %s421_s19 = sshll.u32 %s595_s18, 4  ;;  %s422_s19 = int_to_ptr.vmem [resolvable:$true] %s421_s19 }
  0x5a   :  { %v278_v53 = vadd.f32 %v277_v41, %v267_v45  ;;  %v327_v56 = vstv %s847_s4  ;;  %v307_v58 = vmax.f32 %v306_v51, 0.0  ;;  %v317_v59 = vadd.f32 %v316_v48, %v314_v52  ;;  %s564_s20 = scalar_lea.vmem %s422_s19, 128  ;;  %p569_p2 = scmp.lt.s32.totalorder %s422_s19, %s422_s19 }
  0x5b   :  { %v299_v57 = vmul.f32 %v298_v46, %v296_v50  ;;  %v325_v60 = vmul.f32 %v324_v55, %v644_v0  ;;  %v320_v62 = vstv %s850_s21  ;;  %v335_v63 = vstv %s855_s22  ;;  %p565_p1 = scmp.ne.s32.totalorder %s422_s19, %s564_s20  ;;  %p570_p3 = scmp.lt.s32.totalorder %s564_s20, %s564_s20 }
  0x5c   :  { %v289_v61 = vadd.f32 %v288_v49, %v278_v53  ;;  %v338_v1 = vstv %s857_s23  ;;  %v310_v2 = vmul.f32 %v309_v54, %v307_v58  ;;  %v318_v3 = vmax.f32 %v317_v59, 0.0 }
  0x5d   :  { %v328_v4 = vadd.f32 %v327_v56, %v325_v60  ;;  %v336_v5 = vmul.f32 %v335_v63, %v644_v0  ;;  %v331_v7 = vstv %s860_s24  ;;  %v346_v8 = vstv %s865_s25  ;;  %p571_p4 = por %p570_p3, %p569_p2 }
  0x5e   :  { %v300_v6 = vadd.f32 %v299_v57, %v289_v61  ;;  %v349_v9 = vstv %s867_s26  ;;  %v321_v10 = vmul.f32 %v320_v62, %v318_v3  ;;  %v347_v13 = vmul.f32 %v346_v8, %v644_v0 }
  0x5f   :  { %v329_v11 = vmax.f32 %v328_v4, 0.0  ;;  %v339_v12 = vadd.f32 %v338_v1, %v336_v5  ;;  %v342_v15 = vstv %s870_s1  ;;  %v357_v16 = vstv %s875_s0  ;;  %p572_p5 = pnand %p571_p4, %p565_p1 }
  0x60   :  { %v311_v14 = vadd.f32 %v310_v2, %v300_v6  ;;  %v360_v17 = vstv %s877_s27  ;;  %v350_v20 = vadd.f32 %v349_v9, %v347_v13  ;;  %v358_v21 = vmul.f32 %v357_v16, %v644_v0 }
  0x61   :  { %v332_v18 = vmul.f32 %v331_v7, %v329_v11  ;;  %v340_v19 = vmax.f32 %v339_v12, 0.0  ;;  %v353_v23 = vstv %s880_s28  ;;  %v368_v24 = vstv %s885_s29 }
  0x62   :  { %v322_v22 = vadd.f32 %v321_v10, %v311_v14  ;;  %v371_v25 = vstv %s887_s30  ;;  %v351_v27 = vmax.f32 %v350_v20, 0.0  ;;  %v361_v28 = vadd.f32 %v360_v17, %v358_v21 }
  0x63   :  { %v343_v26 = vmul.f32 %v342_v15, %v340_v19  ;;  %v369_v29 = vmul.f32 %v368_v24, %v644_v0  ;;  %v364_v31 = vstv %s890_s6  ;;  %v379_v32 = vstv %s895_s7 }
  0x64   :  { %v333_v30 = vadd.f32 %v332_v18, %v322_v22  ;;  %v382_v33 = vstv %s897_s8  ;;  %v354_v34 = vmul.f32 %v353_v23, %v351_v27  ;;  %v362_v35 = vmax.f32 %v361_v28, 0.0 }
  0x65   :  { %v372_v36 = vadd.f32 %v371_v25, %v369_v29  ;;  %v380_v37 = vmul.f32 %v379_v32, %v644_v0  ;;  %v375_v39 = vstv %s900_s2  ;;  %v390_v40 = vstv %s905_s9 }
  0x66   :  { %v344_v38 = vadd.f32 %v343_v26, %v333_v30  ;;  %v393_v41 = vstv %s907_s10  ;;  %v365_v42 = vmul.f32 %v364_v31, %v362_v35  ;;  %v391_v45 = vmul.f32 %v390_v40, %v644_v0 }
  0x67   :  { %v373_v43 = vmax.f32 %v372_v36, 0.0  ;;  %v383_v44 = vadd.f32 %v382_v33, %v380_v37  ;;  %v386_v47 = vstv %s910_s11  ;;  %v401_v48 = vstv %s915_s12 }
  0x68   :  { %v355_v46 = vadd.f32 %v354_v34, %v344_v38  ;;  %v404_v49 = vstv %s917_s13  ;;  %v394_v52 = vadd.f32 %v393_v41, %v391_v45  ;;  %v402_v53 = vmul.f32 %v401_v48, %v644_v0 }
  0x69   :  { %v376_v50 = vmul.f32 %v375_v39, %v373_v43  ;;  %v384_v51 = vmax.f32 %v383_v44, 0.0  ;;  %v397_v55 = vstv %s923_s14  ;;  %v408_v60 = vstv %s929_s15 }
  0x6a   :  { %v366_v54 = vadd.f32 %v365_v42, %v355_v46  ;;  %v395_v57 = vmax.f32 %v394_v52, 0.0  ;;  %v405_v58 = vadd.f32 %v404_v49, %v402_v53  ;;  %v412_v3 = vstv %s960_s3 }
  0x6b   :  { %v387_v56 = vmul.f32 %v386_v47, %v384_v51 }
  0x6c   :  { %v377_v59 = vadd.f32 %v376_v50, %v366_v54  ;;  %v398_v61 = vmul.f32 %v397_v55, %v395_v57  ;;  %v406_v62 = vmax.f32 %v405_v58, 0.0 }
  0x6e   :  { %v388_v63 = vadd.f32 %v387_v56, %v377_v59  ;;  %v409_v1 = vmul.f32 %v408_v60, %v406_v62 }
  0x70   :  { %v399_v2 = vadd.f32 %v398_v61, %v388_v63 }
  0x72   :  { %v410_v4 = vadd.f32 %v409_v1, %v399_v2 }
  0x74   :  { %v413_v0 = vadd.f32 %v412_v3, %v410_v4 }
  0x76   :  { %414 = vst [vmem:[#allocation9] sm:$0xff] %v413_v0 }
  0x77   :  { %575 = shalt.err (!%p572_p5)
}
  0x78   :  { %s576_s22 = scalar_lea.hbm %s962_s5, 128 }
  0x79   :  { %p577_p6 = scmp.ne.s32.totalorder %s962_s5, %s576_s22  ;;  %p580_p7 = scmp.lt.u32.totalorder %s576_s22, %s962_s5 }
  0x7b   :  { %p582_p8 = pnand %p580_p7, %p577_p6 }
  0x7d   :  { %585 = shalt.err (!%p582_p8)
}
  0x7e   :  { %424 = dma.vmem_to_hbm [thread:$0]  %s422_s19, 128, %s962_s5, [#allocation4]  }
  0x7f   :  { %590 = dma.done.wait [#allocation4], 128  }
  0x80   :  { %591 = vsyncadd [#allocation4], 4294967168 }
  0x81   :  { %428 = vsyncpa [#allocation4], 1 }
  0x82   :  { %429 = vsyncpa [#allocation5], 1 }
  0x83   :  { %430 = vsyncpa [#allocation7], 1 }

</bundles_post_ra>
